<compile_context>
chip_gen: v5e
topology: v5e:2x2
jax: 0.10.0
libtpu: 0.0.40
codegen_flags: <defaults>
</compile_context>

<pallas_src>
import functools
import math

import numpy as np

import jax
import jax.numpy as jnp
from jax.experimental import pallas as pl
from jax.experimental.pallas import tpu as pltpu


# ----------------------------------------------------------------------------
# Tiling policy (static, shape-derived).
# ----------------------------------------------------------------------------
_LANE = 128
_TL_TARGET_LANES = 32 * 1024            # ~128 KiB per f32 channel-row per tile
_BLOCK_BYTES_BUDGET = 2 * 1024 * 1024   # per-step input block (pre double-buffer)
_VMEM_LIMIT_BYTES = 32 * 1024 * 1024    # safe on v5e/v6e (128 MiB) and v7x (64 MiB)


def _round_up(a, b):
    return (a + b - 1) // b * b


def _tiling(C, H, W, itemsize):
    """Static tile sizes: lane tile TL (multiple of halo width Wh), channel tile tc."""
    L = H * W
    Wh = _round_up(max(W, 1), _LANE)              # halo width: >= W, lane aligned
    if L <= _TL_TARGET_LANES:
        TL = _round_up(L, Wh)                     # one (or few) big lane tiles
    else:
        TL = _round_up(_TL_TARGET_LANES, Wh)
    L_pad = _round_up(L, TL)
    n_l = L_pad // TL

    tc_cap = max(1, _BLOCK_BYTES_BUDGET // (TL * itemsize))
    if C <= tc_cap:
        tc, C_pad = C, C                          # block dim == full dim: always legal
    else:
        sub = 8 if itemsize >= 4 else (16 if itemsize == 2 else 32)
        tc = max(sub, (tc_cap // sub) * sub)      # sublane-aligned channel tile
        C_pad = _round_up(C, tc)                  # zero-padded channels contribute 0
    n_c = C_pad // tc
    return L, L_pad, TL, Wh, n_l, tc, C_pad, n_c


# ----------------------------------------------------------------------------
# Pallas kernel: per-edge squared feature distances (norm2 over channels).
# ----------------------------------------------------------------------------
def _edge_dist_kernel(x_ref, halo_ref, d_ref, *, W):
    """Accumulate squared L2 feature distances over one channel tile.

    x_ref:    (tc, TL)  channel tile, flattened spatial lanes of one batch elem.
    halo_ref: (tc, Wh)  first Wh lanes of the *next* lane tile (same channels).
    d_ref:    (2, TL)   output block, resident across the channel grid axis:
                 row 0: dist(p, p + W)   (down-neighbour edge)
                 row 1: dist(p, p + 1)   (right-neighbour edge)
    Slots whose neighbour leaves the grid (last row / last column / padding)
    hold wrap-around values; the edge list marks them as self-loops so they
    can never enter the tree.
    """
    c = pl.program_id(2)
    tc, TL = x_ref.shape
    Wh = halo_ref.shape[1]

    # f32 before differencing/squaring: avoids bf16 quantization of the edge
    # weights and keeps the VPU path native on v5e (no bf16 datapath there).
    x = x_ref[...].astype(jnp.float32)
    halo = halo_ref[...].astype(jnp.float32)

    # Place the halo so lane i (i >= TL - shift) picks halo[i + shift - TL].
    if TL > Wh:
        halo = jnp.concatenate(
            [halo, jnp.zeros((tc, TL - Wh), jnp.float32)], axis=1)
    nxt_w = pltpu.roll(halo, TL - W, axis=1)
    nxt_1 = pltpu.roll(halo, TL - 1, axis=1)

    # Full-tile rolls (XLU slot) instead of offset slices: every tensor stays
    # (tc, TL) tile-aligned and all stores are full-width.
    lane = jax.lax.broadcasted_iota(jnp.int32, (tc, TL), 1)
    shift_w = jnp.where(lane < TL - W, pltpu.roll(x, TL - W, axis=1), nxt_w)
    shift_1 = jnp.where(lane < TL - 1, pltpu.roll(x, TL - 1, axis=1), nxt_1)

    dr = shift_w - x
    dc = shift_1 - x
    contrib = jnp.concatenate(
        [jnp.sum(dr * dr, axis=0, keepdims=True),
         jnp.sum(dc * dc, axis=0, keepdims=True)], axis=0)      # (2, TL) f32

    # Accumulate straight into the resident output block: no scratch, no
    # finalize copy, no zero-then-overwrite.
    @pl.when(c == 0)
    def _():
        d_ref[...] = contrib

    @pl.when(c != 0)
    def _():
        d_ref[...] += contrib


def _build_edge_distances(x):
    """(B, C, H, W) -> (B, 2, L_pad) squared feature distances.

    out[b, 0, p] = sum_c (x[b,c,p+W] - x[b,c,p])^2   (valid for p <  H*W - W)
    out[b, 1, p] = sum_c (x[b,c,p+1] - x[b,c,p])^2   (valid for p%W != W-1, p < H*W)
    """
    B, C, H, W = x.shape
    itemsize = x.dtype.itemsize
    L, L_pad, TL, Wh, n_l, tc, C_pad, n_c = _tiling(C, H, W, itemsize)

    x_flat = x.reshape(B, C, L)                       # free reshape (contiguous)
    if C_pad != C or L_pad != L:
        # only for ragged shapes; zero channel padding contributes zero distance
        x_flat = jnp.pad(x_flat, ((0, 0), (0, C_pad - C), (0, L_pad - L)))

    halo_blocks_per_tile = TL // Wh                   # TL is a multiple of Wh

    def x_map(b, l, c):
        return (b, c, l)

    def halo_map(b, l, c):
        # first Wh lanes of the next lane tile (clamped; never validly used on
        # the last tile because those slots are off-grid edges anyway)
        return (b, c, jnp.minimum(l + 1, n_l - 1) * halo_blocks_per_tile)

    def out_map(b, l, c):
        return (b, 0, l)

    return pl.pallas_call(
        functools.partial(_edge_dist_kernel, W=W),
        out_shape=jax.ShapeDtypeStruct((B, 2, L_pad), jnp.float32),
        grid=(B, n_l, n_c),
        in_specs=[
            pl.BlockSpec((None, tc, TL), x_map),
            pl.BlockSpec((None, tc, Wh), halo_map),
        ],
        out_specs=pl.BlockSpec((None, 2, TL), out_map),
        compiler_params=pltpu.CompilerParams(
            dimension_semantics=("parallel", "parallel", "arbitrary"),
            vmem_limit_bytes=_VMEM_LIMIT_BYTES,
        ),
    )(x_flat, x_flat)


# ----------------------------------------------------------------------------
# Glue: edge endpoints in the kernel's flat slot order (no concat/reshape pass).
# ----------------------------------------------------------------------------
def _build_edge_index_flat(H, W, L_pad):
    """Length-2*L_pad edge endpoint arrays.

    Slot p          : row edge (p, p + W)   — self-loop (0, 0) if invalid.
    Slot L_pad + p  : col edge (p, p + 1)   — self-loop (0, 0) if invalid.
    Self-loops can never be selected by Boruvka (both endpoints share a root),
    so the kernel's wrap-around weights at those slots are irrelevant.
    """
    L = H * W
    p = jnp.arange(L_pad, dtype=jnp.int32)
    row_valid = p < (L - W)
    col_valid = (p < L) & ((p % W) != (W - 1))
    zero = jnp.zeros_like(p)
    edge_u = jnp.concatenate([jnp.where(row_valid, p, zero),
                              jnp.where(col_valid, p, zero)])
    edge_v = jnp.concatenate([jnp.where(row_valid, p + W, zero),
                              jnp.where(col_valid, p + 1, zero)])
    return edge_u, edge_v


# ----------------------------------------------------------------------------
# Glue: Boruvka minimum spanning tree via scatter / segment reductions.
# (replaces the sequential union-find of _C.mst_forward)
# ----------------------------------------------------------------------------
def _boruvka_minimum_spanning_tree(edge_u, edge_v, dist, num_vertices):
    E = edge_u.shape[0]
    V = num_vertices
    n_rounds = max(1, int(math.ceil(math.log2(max(2, V)))))
    vid = jnp.arange(V, dtype=jnp.int32)
    e_idx = jnp.arange(E, dtype=jnp.int32)
    big = jnp.int32(E)

    def compress(parent):
        return jax.lax.fori_loop(0, n_rounds + 1, lambda _, p: p[p], parent)

    def round_body(_, carry):
        parent, selected = carry
        root = compress(parent)
        ru = root[edge_u]
        rv = root[edge_v]
        cross = ru != rv
        w_eff = jnp.where(cross, dist, jnp.inf)

        # per-component minimum incident cross-edge weight (scatter-min, O(E))
        best_w = (jnp.full((V,), jnp.inf, dist.dtype)
                  .at[ru].min(w_eff).at[rv].min(w_eff))
        # tie-break by smallest edge index among the minimisers -> total order
        cand_u = jnp.where(cross & (w_eff == best_w[ru]), e_idx, big)
        cand_v = jnp.where(cross & (w_eff == best_w[rv]), e_idx, big)
        best_e = (jnp.full((V,), big, jnp.int32)
                  .at[ru].min(cand_u).at[rv].min(cand_v))

        has_edge = best_e < big
        best_e_safe = jnp.where(has_edge, best_e, 0)
        propose = has_edge & (root == vid)            # only component roots hook

        # record chosen edges
        scatter_idx = jnp.where(propose, best_e_safe, big)
        newly = jnp.zeros((E + 1,), bool).at[scatter_idx].set(True)[:E]
        selected = selected | newly

        # hook each proposing root onto the other endpoint's component root
        eu_r = ru[best_e_safe]
        ev_r = rv[best_e_safe]
        other = jnp.where(eu_r == vid, ev_r, eu_r)
        parent_new = jnp.where(propose, other, root)
        # break mutual 2-cycles (the only cycles possible): smaller id is root
        mutual = (parent_new[parent_new] == vid) & (parent_new != vid)
        parent = jnp.where(mutual & (vid < parent_new), vid, parent_new)
        return parent, selected

    parent, selected = jax.lax.fori_loop(
        0, n_rounds, round_body, (vid, jnp.zeros((E,), bool)))

    # connected 4-neighbour grid graph ⇒ exactly V-1 selected tree edges
    sel = jnp.nonzero(selected, size=V - 1, fill_value=0)[0]
    return jnp.stack([edge_u[sel], edge_v[sel]], axis=1).astype(jnp.int32)


# ----------------------------------------------------------------------------
# Module forward: MinimumSpanningTree(distance_func=norm2, mapping_func=exp/None)
# ----------------------------------------------------------------------------
@jax.jit
def minimum_spanning_tree(guide_in):
    B, C, H, W = guide_in.shape
    V = H * W
    d_full = _build_edge_distances(guide_in)            # (B, 2, L_pad) f32
    L_pad = d_full.shape[2]
    dist = d_full.reshape(B, 2 * L_pad)                 # free reshape, no concat pass
    edge_u, edge_v = _build_edge_index_flat(H, W, L_pad)
    tree = jax.vmap(
        lambda w: _boruvka_minimum_spanning_tree(edge_u, edge_v, w, V))(dist)
    return tree                                         # (B, V-1, 2) int32


if __name__ == "__main__":
    key = jax.random.PRNGKey(0)
    B, C, H, W = 2, 4, 16, 16
    V = H * W
    L = H * W
    guide_in = jax.random.normal(key, (B, C, H, W), dtype=jnp.float32)

    tree = jax.block_until_ready(minimum_spanning_tree(guide_in))
    assert tree.shape == (B, V - 1, 2), tree.shape
    assert tree.dtype == jnp.int32, tree.dtype

    # ---- host-side verification: distances ---------------------------------
    d_full = np.asarray(jax.block_until_ready(
        jax.jit(_build_edge_distances)(guide_in)))       # (B, 2, L_pad)

    g = np.asarray(guide_in, dtype=np.float64)
    ref_row = ((g[:, :, 1:, :] - g[:, :, :-1, :]) ** 2).sum(axis=1).reshape(B, -1)
    ref_col = ((g[:, :, :, 1:] - g[:, :, :, :-1]) ** 2).sum(axis=1).reshape(B, -1)
    got_row = d_full[:, 0, : L - W]
    got_col = d_full[:, 1, :L].reshape(B, H, W)[:, :, : W - 1].reshape(B, -1)
    np.testing.assert_allclose(got_row, ref_row, rtol=1e-4, atol=1e-4)
    np.testing.assert_allclose(got_col, ref_col, rtol=1e-4, atol=1e-4)

    # ---- host-side verification: the tree is a valid MST of the grid graph --
    pairs = [(p, p + W) for p in range(L - W)]
    col_slots = [p for p in range(L) if p % W != W - 1]
    pairs += [(p, p + 1) for p in col_slots]
    pairs = np.array(pairs, dtype=np.int64)                       # (E_valid, 2)
    w_valid = np.concatenate(
        [d_full[:, 0, : L - W], d_full[:, 1, np.array(col_slots)]], axis=1)

    edge_id = {}
    for e, (u, v) in enumerate(pairs):
        edge_id[(int(u), int(v))] = e
        edge_id[(int(v), int(u))] = e

    def find(parent, a):
        while parent[a] != a:
            parent[a] = parent[parent[a]]
            a = parent[a]
        return a

    tree_np = np.asarray(tree)
    for b in range(B):
        w = w_valid[b].astype(np.float64)
        # reference MST cost via Kruskal on the kernel's own weights
        parent = list(range(V))
        ref_cost, n_ref = 0.0, 0
        for e in np.argsort(w, kind="stable"):
            u, v = int(pairs[e, 0]), int(pairs[e, 1])
            ru, rv = find(parent, u), find(parent, v)
            if ru != rv:
                parent[ru] = rv
                ref_cost += w[e]
                n_ref += 1
        assert n_ref == V - 1
        # kernel tree: valid grid edges, no duplicates, acyclic, same total cost
        parent = list(range(V))
        cost, used = 0.0, set()
        for u, v in tree_np[b]:
            e = edge_id[(int(u), int(v))]          # KeyError => not a grid edge
            assert e not in used
            used.add(e)
            ru, rv = find(parent, int(u)), find(parent, int(v))
            assert ru != rv, "cycle in spanning tree"
            parent[ru] = rv
            cost += w[e]
        assert abs(cost - ref_cost) <= 1e-6 * max(1.0, abs(ref_cost)), (cost, ref_cost)

    print("KERNEL_OK")
</pallas_src>

<mosaic_0001>
module attributes {stable_mosaic.version = 11 : i64} {
  func.func @_edge_dist_kernel(%arg0: i32, %arg1: i32, %arg2: i32, %arg3: memref<1x4x256xf32, #tpu.memory_space<vmem>>, %arg4: memref<1x4x128xf32, #tpu.memory_space<vmem>>, %arg5: memref<1x2x256xf32, #tpu.memory_space<vmem>>) attributes {dimension_semantics = [#tpu.dimension_semantics<parallel>, #tpu.dimension_semantics<parallel>, #tpu.dimension_semantics<arbitrary>], iteration_bounds = array<i64: 2, 1, 1>, scalar_prefetch = 0 : i64, scratch_operands = 0 : i64, tpu.core_type = #tpu.core_type<tc>, window_params = [{transform_indices = @transform_0, window_bounds = array<i64: 1, 4, 256>}, {transform_indices = @transform_1, window_bounds = array<i64: 1, 4, 128>}, {transform_indices = @transform_2, window_bounds = array<i64: 1, 2, 256>}]} {
    %c0 = arith.constant 0 : index
    %c0_0 = arith.constant 0 : index
    %c0_1 = arith.constant 0 : index
    %0 = vector.load %arg3[%c0, %c0_0, %c0_1] : memref<1x4x256xf32, #tpu.memory_space<vmem>>, vector<1x4x256xf32>
    %1 = vector.shape_cast %0 : vector<1x4x256xf32> to vector<4x256xf32>
    %c0_2 = arith.constant 0 : index
    %c0_3 = arith.constant 0 : index
    %c0_4 = arith.constant 0 : index
    %2 = vector.load %arg4[%c0_2, %c0_3, %c0_4] : memref<1x4x128xf32, #tpu.memory_space<vmem>>, vector<1x4x128xf32>
    %3 = vector.shape_cast %2 : vector<1x4x128xf32> to vector<4x128xf32>
    %cst = arith.constant 0.000000e+00 : f32
    %4 = vector.broadcast %cst : f32 to vector<4x128xf32>
    %5 = tpu.concatenate %3, %4 in 1 : vector<4x128xf32>, vector<4x128xf32> -> vector<4x256xf32>
    %c240_i32 = arith.constant 240 : i32
    %6 = tpu.dynamic_rotate %5 by %c240_i32 dim 1 : vector<4x256xf32>, i32 -> vector<4x256xf32>
    %c255_i32 = arith.constant 255 : i32
    %7 = tpu.dynamic_rotate %5 by %c255_i32 dim 1 : vector<4x256xf32>, i32 -> vector<4x256xf32>
    %8 = tpu.iota {dimensions = array<i32: 1>} : vector<4x256xi32>
    %c240_i32_5 = arith.constant 240 : i32
    %9 = vector.broadcast %c240_i32_5 : i32 to vector<4x256xi32>
    %10 = arith.cmpi slt, %8, %9 : vector<4x256xi32>
    %c240_i32_6 = arith.constant 240 : i32
    %11 = tpu.dynamic_rotate %1 by %c240_i32_6 dim 1 : vector<4x256xf32>, i32 -> vector<4x256xf32>
    %12 = arith.select %10, %11, %6 : vector<4x256xi1>, vector<4x256xf32>
    %c255_i32_7 = arith.constant 255 : i32
    %13 = vector.broadcast %c255_i32_7 : i32 to vector<4x256xi32>
    %14 = arith.cmpi slt, %8, %13 : vector<4x256xi32>
    %c255_i32_8 = arith.constant 255 : i32
    %15 = tpu.dynamic_rotate %1 by %c255_i32_8 dim 1 : vector<4x256xf32>, i32 -> vector<4x256xf32>
    %16 = arith.select %14, %15, %7 : vector<4x256xi1>, vector<4x256xf32>
    %17 = arith.subf %12, %1 : vector<4x256xf32>
    %18 = arith.subf %16, %1 : vector<4x256xf32>
    %19 = arith.mulf %17, %17 : vector<4x256xf32>
    %cst_9 = arith.constant dense<0.000000e+00> : vector<256xf32>
    %20 = vector.multi_reduction <add>, %19, %cst_9 [0] : vector<4x256xf32> to vector<256xf32>
    %21 = vector.shape_cast %20 : vector<256xf32> to vector<1x256xf32>
    %22 = arith.mulf %18, %18 : vector<4x256xf32>
    %cst_10 = arith.constant dense<0.000000e+00> : vector<256xf32>
    %23 = vector.multi_reduction <add>, %22, %cst_10 [0] : vector<4x256xf32> to vector<256xf32>
    %24 = vector.shape_cast %23 : vector<256xf32> to vector<1x256xf32>
    %25 = tpu.concatenate %21, %24 in 0 : vector<1x256xf32>, vector<1x256xf32> -> vector<2x256xf32>
    %c0_i32 = arith.constant 0 : i32
    %26 = arith.cmpi eq, %arg2, %c0_i32 : i32
    %27 = arith.extui %26 : i1 to i32
    %c0_i32_11 = arith.constant 0 : i32
    %28 = arith.cmpi ne, %27, %c0_i32_11 : i32
    scf.if %28 {
      %c0_14 = arith.constant 0 : index
      %c0_15 = arith.constant 0 : index
      %c0_16 = arith.constant 0 : index
      %32 = vector.load %arg5[%c0_14, %c0_15, %c0_16] : memref<1x2x256xf32, #tpu.memory_space<vmem>>, vector<1x2x256xf32>
      %33 = vector.shape_cast %32 : vector<1x2x256xf32> to vector<2x256xf32>
      %34 = vector.shape_cast %25 : vector<2x256xf32> to vector<1x2x256xf32>
      tpu.vector_store %arg5[%c0_14, %c0_15, %c0_16], %34 {strides = array<i32>} : memref<1x2x256xf32, #tpu.memory_space<vmem>>, vector<1x2x256xf32>,
    } else {
    }
    %c0_i32_12 = arith.constant 0 : i32
    %29 = arith.cmpi ne, %arg2, %c0_i32_12 : i32
    %30 = arith.extui %29 : i1 to i32
    %c0_i32_13 = arith.constant 0 : i32
    %31 = arith.cmpi ne, %30, %c0_i32_13 : i32
    scf.if %31 {
      %c0_14 = arith.constant 0 : index
      %c0_15 = arith.constant 0 : index
      %c0_16 = arith.constant 0 : index
      %32 = vector.load %arg5[%c0_14, %c0_15, %c0_16] : memref<1x2x256xf32, #tpu.memory_space<vmem>>, vector<1x2x256xf32>
      %33 = vector.shape_cast %32 : vector<1x2x256xf32> to vector<2x256xf32>
      %34 = arith.addf %33, %25 : vector<2x256xf32>
      %c0_17 = arith.constant 0 : index
      %c0_18 = arith.constant 0 : index
      %c0_19 = arith.constant 0 : index
      %35 = vector.load %arg5[%c0_17, %c0_18, %c0_19] : memref<1x2x256xf32, #tpu.memory_space<vmem>>, vector<1x2x256xf32>
      %36 = vector.shape_cast %35 : vector<1x2x256xf32> to vector<2x256xf32>
      %37 = vector.shape_cast %34 : vector<2x256xf32> to vector<1x2x256xf32>
      tpu.vector_store %arg5[%c0_17, %c0_18, %c0_19], %37 {strides = array<i32>} : memref<1x2x256xf32, #tpu.memory_space<vmem>>, vector<1x2x256xf32>,
    } else {
    }
    return
  }
  func.func @transform_0(%arg0: i32, %arg1: i32, %arg2: i32) -> (i32, i32, i32) {
    %c0_i32 = arith.constant 0 : i32
    return %arg0, %arg2, %arg1 : i32, i32, i32
  }
  func.func @transform_1(%arg0: i32, %arg1: i32, %arg2: i32) -> (i32, i32, i32) {
    %c1_i32 = arith.constant 1 : i32
    %0 = arith.addi %arg1, %c1_i32 : i32
    %c0_i32 = arith.constant 0 : i32
    %1 = arith.minsi %0, %c0_i32 : i32
    %c2_i32 = arith.constant 2 : i32
    %2 = arith.muli %1, %c2_i32 : i32
    %c0_i32_0 = arith.constant 0 : i32
    return %arg0, %arg2, %2 : i32, i32, i32
  }
  func.func @transform_2(%arg0: i32, %arg1: i32, %arg2: i32) -> (i32, i32, i32) {
    %c0_i32 = arith.constant 0 : i32
    %c0_i32_0 = arith.constant 0 : i32
    return %arg0, %c0_i32, %arg1 : i32, i32, i32
  }
}

</mosaic_0001>

<bundles_post_ra>
// kernel: custom-call.14
= control target key start
LH: loop header
LB: loop body
LE: loop exit
PB: predicated region body
PF: predicated region fallthrough
CT: control target
= control target key end

     0   :  { %s6_s0 = inlined_call_operand.vmem [shape: pred[2,512], index: 0, kind: output, shape index: {}]  }

// kernel: minimum_spanning_tree.1
= control target key start
LH: loop header
LB: loop body
LE: loop exit
PB: predicated region body
PF: predicated region fallthrough
CT: control target
= control target key end

     0   :  { %s606_s9 = smov 0   ;;  %s608_s10 = smov 0   ;;  %s650_s0 = inlined_call_operand.vmem [shape: f32[2,4,256], index: 0, kind: input, shape index: {}, may-alias: {0,1}]   ;;  %s651_s1 = inlined_call_operand.vmem [shape: f32[2,4,256], index: 1, kind: input, shape index: {}, may-alias: {0,1}]   ;;  %s652_s2 = inlined_call_operand.vmem [shape: f32[2,2,256], index: 2, kind: output, shape index: {}]  }
   0x1   :  { %s610_s11 = smov 0  }
   0x2 LB: > { %s31_s12 = sadd.s32 1, %s582_s10  ;;  %p525_p0 = scmp.ge.s32.totalorder %s586_s11, 1  ;;  %s586_s11 = sphi %s610_s11, %s12_s11   ;;  %s582_s10 = sphi %s608_s10, %s654_s10   ;;  %s578_s9 = sphi %s606_s9, %s653_s9  }
   0x3   : > { %p33_p1 = scmp.ge.s32.totalorder %s31_s12, 2  ;;  %p183_p2 = scmp.lt.s32.totalorder %s586_s11, 3 }
   0x5   : > { %s656_s12 = smov (%p33_p1, %s31_s12), 0  ;;  %p184_p3 = pnand %p525_p0, %p183_p2 }
   0x6   : > { %p234_p4 = scmp.lt.s32.totalorder (!%p184_p3), %s578_s9, 1  ;;  %s588_s20 = smov (!%p184_p3), 127  }
   0x7   : > { %187 = sbr.rel (%p184_p3) target bundleno = 172 (0xac), region = 28  ;;  %s589_s21 = smov (!%p184_p3), 112  }
   0xc   : > { %s658_s9 = smov (!%p234_p4, %s578_s9), 1  ;;  %v590_v4 = vmov 0.0   ;;  %v283_v10 = vlaneseq  ;;  %vm343_vm2 = vcmask 1043456   ;;  %vm374_vm5 = vcmask 1040384  }
   0xd   : > { %s534_s13 = sshll.u32 %s658_s9, 3  ;;  %s536_s22 = sshll.u32 %s658_s9, 2  ;;  %vm384_vm6 = vcmask 1041408  }
   0xe   : > { %s262_s16 = scalar_lea.vmem %s651_s1, %s534_s13  ;;  %s245_s19 = scalar_lea.vmem %s650_s0, %s534_s13  ;;  %v284_v11 = vand.u32 127, %v283_v10 }
   0xf   : > { %v278_v0 = vld [vmem:[%s262_s16] sm:$0xf]  ;;  %s275_s25 = scalar_lea.vmem %s652_s2, %s536_s22 }
  0x10   : > { %288 = vrot.lane.b32.xlu1 %v278_v0, %s588_s20  ;;  %v277_v1 = vld [vmem:[%s245_s19] sm:$0xff]  ;;  %279 = vrot.lane.b32.xlu0 %v278_v0, %s589_s21  ;;  %vm285_vm0 = vcmp.lt.s32.totalorder %v284_v11, 112  ;;  %v295_v16 = vadd.s32 128, %v284_v11  ;;  %vm292_vm3 = vcmp.lt.s32.totalorder %v284_v11, 127 }
  0x11   : > { %299 = vst [vmem:[#allocation1] ss:$2 sm:$0xff] %v277_v1 }
  0x12   : > { %vm297_vm1 = vcmp.lt.s32.totalorder %v295_v16, 240  ;;  %vm313_vm4 = vcmp.lt.s32.totalorder %v295_v16, 255 }
  0x18   : > { %v300_v2 = vld.sshfl [vmem:[#allocation1] sm:$0xff pattern:$0x75316420]  ;;  %v301_v3 = vld.sshfl [vmem:[#allocation1 + $0x8] sm:$0xff pattern:$0x75316420]  ;;  %290 = vrot.lane.b32.xlu1 %v590_v4, %s588_s20  ;;  %281 = vrot.lane.b32.xlu0 %v590_v4, %s589_s21 }
  0x19   : > { %314 = vst [vmem:[#allocation1] ss:$2 sm:$0xff] %v277_v1  ;;  %304 = vrot.lane.b32.xlu2 %v300_v2, %s589_s21 }
  0x20   : > { %v316_v5 = vld.sshfl [vmem:[#allocation1 + $0x8] sm:$0xff pattern:$0x75316420]  ;;  %v315_v6 = vld.sshfl [vmem:[#allocation1] sm:$0xff pattern:$0x75316420] }
  0x21   : > { %321 = vrot.lane.b32.xlu1 %v316_v5, %s588_s20  ;;  %319 = vrot.lane.b32.xlu0 %v315_v6, %s588_s20  ;;  %327 = vst [vmem:[#allocation1] ss:$2 sm:$0xff] %v277_v1 }
  0x22   : > { %306 = vrot.lane.b32.xlu2 %v301_v3, %s589_s21 }
  0x28   : > { %v328_v7 = vld.sshfl [vmem:[#allocation1] sm:$0xff pattern:$0x75316420]  ;;  %v329_v8 = vld.sshfl [vmem:[#allocation1 + $0x8] sm:$0xff pattern:$0x75316420] }
  0x29   : > { %334 = vst [vmem:[#allocation1] ss:$2 sm:$0xff] %v277_v1 }
  0x30   : > { %v335_v29 = vld.sshfl [vmem:[#allocation1] sm:$0xff pattern:$0x75316420]  ;;  %v336_v33 = vld.sshfl [vmem:[#allocation1 + $0x8] sm:$0xff pattern:$0x75316420] }
  0x73   : > { %v305_v9 = vpop.permute.xlu2 %304 }
  0x7c   : > { %v307_v12 = vpop.permute.xlu2 %306 }
  0x7d   : > { %v308_v15 = vsel %vm285_vm0, %v305_v9, %v307_v12  ;;  %v309_v18 = vsel %vm285_vm0, %v307_v12, %v305_v9 }
  0x7e   : > { %v332_v17 = vsub.f32 %v308_v15, %v328_v7 }
  0x80   : > { %v341_v22 = vmul.f32 %v332_v17, %v332_v17 }
  0x82   : > { %v289_v13 = vpop.permute.xlu1 %288  ;;  %v280_v14 = vpop.permute.xlu0 %279  ;;  %v344_v26 = vsel %vm343_vm2, %v341_v22, 0.0 }
  0x83   : > { %v345_v30 = vrot.slane %v344_v26, 4 }
  0x85   : > { %v346_v41 = vadd.f32 %v345_v30, %v344_v26 }
  0x87   : > { %v347_v48 = vrot.slane %v346_v41, 2 }
  0x89   : > { %v348_v54 = vadd.f32 %v347_v48, %v346_v41 }
  0x8a   : > { %v291_v19 = vpop.permute.xlu1 %290  ;;  %v282_v20 = vpop.permute.xlu0 %281 }
  0x8b   : > { %v287_v21 = vsel %vm285_vm0, %v282_v20, %v280_v14  ;;  %v294_v34 = vsel %vm292_vm3, %v291_v19, %v289_v13  ;;  %v349_v60 = vrot.slane %v348_v54, 1 }
  0x8c   : > { %v311_v23 = vsel %vm297_vm1, %v309_v18, %v287_v21 }
  0x8d   : > { %v333_v24 = vsub.f32 %v311_v23, %v329_v8  ;;  %v350_v1 = vadd.f32 %v349_v60, %v348_v54 }
  0x8f   : > { %v342_v25 = vmul.f32 %v333_v24, %v333_v24 }
  0x91   : > { %v351_v27 = vsel %vm343_vm2, %v342_v25, 0.0 }
  0x92   : > { %v352_v28 = vrot.slane %v351_v27, 4 }
  0x93   : > { %v322_v31 = vpop.permute.xlu1 %321  ;;  %v320_v32 = vpop.permute.xlu0 %319 }
  0x94   : > { %v323_v35 = vsel %vm292_vm3, %v320_v32, %v322_v31  ;;  %v324_v36 = vsel %vm292_vm3, %v322_v31, %v320_v32  ;;  %v353_v37 = vadd.f32 %v352_v28, %v351_v27 }
  0x95   : > { %v326_v38 = vsel %vm313_vm4, %v324_v36, %v294_v34  ;;  %v339_v39 = vsub.f32 %v323_v35, %v335_v29 }
  0x96   : > { %v340_v40 = vsub.f32 %v326_v38, %v336_v33  ;;  %v354_v44 = vrot.slane %v353_v37, 2 }
  0x97   : > { %v358_v42 = vmul.f32 %v339_v39, %v339_v39 }
  0x98   : > { %v359_v43 = vmul.f32 %v340_v40, %v340_v40  ;;  %v355_v51 = vadd.f32 %v354_v44, %v353_v37 }
  0x99   : > { %v360_v45 = vsel %vm343_vm2, %v358_v42, 0.0 }
  0x9a   : > { %v361_v46 = vrot.slane %v360_v45, 4  ;;  %v367_v47 = vsel %vm343_vm2, %v359_v43, 0.0  ;;  %v356_v57 = vrot.slane %v355_v51, 1 }
  0x9b   : > { %v368_v49 = vrot.slane %v367_v47, 4 }
  0x9c   : > { %v362_v50 = vadd.f32 %v361_v46, %v360_v45  ;;  %v357_v62 = vadd.f32 %v356_v57, %v355_v51 }
  0x9d   : > { %v369_v52 = vadd.f32 %v368_v49, %v367_v47 }
  0x9e   : > { %v363_v53 = vrot.slane %v362_v50, 2 }
  0x9f   : > { %v370_v55 = vrot.slane %v369_v52, 2 }
  0xa0   : > { %v364_v56 = vadd.f32 %v363_v53, %v362_v50 }
  0xa1   : > { %v371_v58 = vadd.f32 %v370_v55, %v369_v52 }
  0xa2   : > { %v365_v59 = vrot.slane %v364_v56, 1 }
  0xa3   : > { %v372_v61 = vrot.slane %v371_v58, 1 }
  0xa4   : > { %v366_v63 = vadd.f32 %v365_v59, %v364_v56 }
  0xa5   : > { %v373_v0 = vadd.f32 %v372_v61, %v371_v58 }
  0xa6   : > { %v375_v4 = vsel %vm374_vm5, %v350_v1, %v366_v63 }
  0xa7   : > { %v376_v2 = vsel %vm374_vm5, %v357_v62, %v373_v0 }
  0xa8   : > { %v383_v3 = vrot.slane %v376_v2, 6 }
  0xaa   : > { %v385_v5 = vsel %vm384_vm6, %v375_v4, %v383_v3 }
  0xab   : > { %387 = vst [vmem:[%s275_s25] sm:$0xf] %v385_v5 }
  0xac PF: > { %s12_s11 = sadd.s32 1, %s586_s11   ;;  %s653_s9 = smov %s582_s10 }
  0xad   : > { %p9_p5 = scmp.ge.s32.totalorder %s12_s11, 4   ;;  %s654_s10 = smov %s656_s12 }
  0xaf   :  { %11 = sbr.rel (!%p9_p5) target bundleno = 2 (0x2), region = 69 }

</bundles_post_ra>
